<compile_context>
chip_gen: v6e
topology: v6e:2x2x1
jax: 0.10.0
libtpu: 0.0.40
codegen_flags: <defaults>
</compile_context>

<pallas_src>
import jax
import jax.numpy as jnp
from jax.experimental import pallas as pl
from jax.experimental.pallas import tpu as pltpu


def _round_up(v, m):
    return ((v + m - 1) // m) * m


def _regressor_kernel(x_ref, w1_ref, b1_ref, w23_ref, b23_ref, o_ref):
    # Hidden layer, transposed so the batch lives on LANES:
    #   h (M, TB) = W1 (M, D) contracted with x_tile (TB, D) over D
    # i.e. W1 @ x_tile^T — x is consumed untransposed straight from HBM.
    h = jax.lax.dot_general(
        w1_ref[...], x_ref[...],
        dimension_numbers=(((1,), (1,)), ((), ())),
        preferred_element_type=jnp.float32)          # MXU, f32 accumulation
    h = jnp.maximum(h + b1_ref[...], 0.0)             # (M,1) bias lane-broadcast; VPU

    # Both scalar heads fused into one matmul: (2, M) @ (M, TB) -> (2, TB).
    o = jnp.dot(w23_ref[...], h, preferred_element_type=jnp.float32)
    o_ref[...] = (o + b23_ref[...]).astype(o_ref.dtype)   # fold b2/b3 in-kernel


def regressor_forward(x, params, *, block_b_max=16384, compute_dtype=jnp.bfloat16):
    """x: (B, input_dim). params: nn.Linear-shaped weights/biases. Returns (x1, x2)."""
    B, D = x.shape
    M = params["w1"].shape[0]                               # mid_dim

    # bf16 streaming of the dominant input stream (x) and W1; accumulation and
    # everything downstream of the first matmul stays f32.  Under jit the cast
    # fuses with whatever produced x; pass x already in bf16 to skip it.
    x_in = x if x.dtype == compute_dtype else x.astype(compute_dtype)
    w1 = params["w1"].astype(compute_dtype)                                  # (M, D)
    b1 = params["b1"].astype(jnp.float32).reshape(M, 1)                      # (M, 1)
    w23 = jnp.concatenate([params["w2"], params["w3"]], axis=0).astype(jnp.float32)  # (2, M)
    b23 = jnp.stack([params["b2"], params["b3"]]).reshape(2, 1).astype(jnp.float32)  # (2, 1)

    # ---- batch tiling: no padding / no copy of x. ----
    Bp128 = _round_up(B, 128)
    # >= 2 grid steps whenever there's enough work: shards the "parallel" axis
    # across both v7x TensorCores; negligible overhead on single-TC v5e/v6e.
    n_tiles = max(pl.cdiv(Bp128, block_b_max), 2 if Bp128 >= 256 else 1)
    block_b = _round_up(pl.cdiv(Bp128, n_tiles), 128)
    if block_b >= B:
        block_b = B                                   # single full-extent block
        grid = (1,)
    else:
        grid = (pl.cdiv(B, block_b),)                 # partial last tile is masked

    x_spec = pl.BlockSpec((block_b, D), lambda i: (i, 0))
    w1_spec = pl.BlockSpec((M, D), lambda i: (0, 0))
    b1_spec = pl.BlockSpec((M, 1), lambda i: (0, 0))
    w23_spec = pl.BlockSpec((2, M), lambda i: (0, 0))
    b23_spec = pl.BlockSpec((2, 1), lambda i: (0, 0))
    out_spec = pl.BlockSpec((2, block_b), lambda i: (0, i))

    b_work = grid[0] * block_b
    cost = pl.CostEstimate(
        flops=2 * b_work * D * M + 2 * b_work * M * 2,
        transcendentals=0,
        bytes_accessed=(b_work * D * x_in.dtype.itemsize
                        + M * D * w1.dtype.itemsize
                        + (M + 2 * M + 2) * 4
                        + 2 * B * 4),
    )

    out = pl.pallas_call(
        _regressor_kernel,
        grid_spec=pltpu.PrefetchScalarGridSpec(
            num_scalar_prefetch=0,
            grid=grid,
            in_specs=[x_spec, w1_spec, b1_spec, w23_spec, b23_spec],
            out_specs=out_spec,
        ),
        out_shape=jax.ShapeDtypeStruct((2, B), jnp.float32),
        compiler_params=pltpu.CompilerParams(
            dimension_semantics=("parallel",)),
        cost_estimate=cost,
    )(x_in, w1, b1, w23, b23)

    x1 = out[0].reshape(B, 1)
    x2 = out[1].reshape(B, 1)
    return x1, x2


def init_params(key, input_dim, mid_dim):
    """Deterministic synthetic parameters with exact nn.Linear shapes."""
    k1, k2, k3, k4, k5, k6 = jax.random.split(key, 6)
    s1 = 1.0 / jnp.sqrt(input_dim)
    s2 = 1.0 / jnp.sqrt(mid_dim)
    return {
        "w1": jax.random.uniform(k1, (mid_dim, input_dim), jnp.float32, -s1, s1),
        "b1": jax.random.uniform(k2, (mid_dim,), jnp.float32, -s1, s1),
        "w2": jax.random.uniform(k3, (1, mid_dim), jnp.float32, -s2, s2),
        "b2": jax.random.uniform(k4, (1,), jnp.float32, -s2, s2),
        "w3": jax.random.uniform(k5, (1, mid_dim), jnp.float32, -s2, s2),
        "b3": jax.random.uniform(k6, (1,), jnp.float32, -s2, s2),
    }


def reference_forward(x, p):
    """Pure-f32 reference matching the PyTorch module semantics."""
    hp = jax.lax.Precision.HIGHEST
    h = jnp.maximum(jnp.dot(x, p["w1"].T, precision=hp) + p["b1"], 0.0)
    x1 = jnp.dot(h, p["w2"].T, precision=hp) + p["b2"]
    x2 = jnp.dot(h, p["w3"].T, precision=hp) + p["b3"]
    return x1, x2


def reference_forward_matched(x, p):
    """Reference with the same bf16 rounding of the streamed operands (x, W1)."""
    hp = jax.lax.Precision.HIGHEST
    xb = x.astype(jnp.bfloat16).astype(jnp.float32)
    w1b = p["w1"].astype(jnp.bfloat16).astype(jnp.float32)
    h = jnp.maximum(jnp.dot(xb, w1b.T, precision=hp) + p["b1"], 0.0)
    x1 = jnp.dot(h, p["w2"].T, precision=hp) + p["b2"]
    x2 = jnp.dot(h, p["w3"].T, precision=hp) + p["b3"]
    return x1, x2


if __name__ == "__main__":
    key = jax.random.PRNGKey(0)
    k_param, k_x = jax.random.split(key)

    # Small shapes consistent with the module; batch deliberately NOT a
    # multiple of 128 to exercise the masked boundary tile (no padding path).
    batch, input_dim, mid_dim = 200, 32, 64
    params = init_params(k_param, input_dim, mid_dim)
    x = jax.random.normal(k_x, (batch, input_dim), jnp.float32)

    out1, out2 = regressor_forward(x, params)
    jax.block_until_ready((out1, out2))
    assert out1.shape == (batch, 1) and out2.shape == (batch, 1)

    # Tight check against a reference that applies the same bf16 rounding to
    # the streamed operands (kernel matmuls accumulate in f32).
    ref1m, ref2m = reference_forward_matched(x, params)
    assert jnp.allclose(out1, ref1m, atol=5e-3, rtol=5e-3)
    assert jnp.allclose(out2, ref2m, atol=5e-3, rtol=5e-3)

    # Loose check against the pure-f32 module semantics (bf16 input streaming).
    ref1, ref2 = reference_forward(x, params)
    assert jnp.allclose(out1, ref1, atol=3e-2, rtol=3e-2)
    assert jnp.allclose(out2, ref2, atol=3e-2, rtol=3e-2)

    print("KERNEL_OK")
</pallas_src>

<mosaic_0001>
module attributes {stable_mosaic.version = 11 : i64} {
  func.func @_regressor_kernel(%arg0: i32, %arg1: memref<128x32xbf16, #tpu.memory_space<vmem>>, %arg2: memref<64x32xbf16, #tpu.memory_space<vmem>>, %arg3: memref<64x1xf32, #tpu.memory_space<vmem>>, %arg4: memref<2x64xf32, #tpu.memory_space<vmem>>, %arg5: memref<2x1xf32, #tpu.memory_space<vmem>>, %arg6: memref<2x128xf32, #tpu.memory_space<vmem>>) attributes {dimension_semantics = [#tpu.dimension_semantics<parallel>], iteration_bounds = array<i64: 2>, scalar_prefetch = 0 : i64, scratch_operands = 0 : i64, tpu.core_type = #tpu.core_type<tc>, window_params = [{transform_indices = @transform_0, window_bounds = array<i64: 128, 32>}, {pipeline_mode = #tpu.pipeline_mode<synchronous>, transform_indices = @transform_1, window_bounds = array<i64: 64, 32>}, {pipeline_mode = #tpu.pipeline_mode<synchronous>, transform_indices = @transform_2, window_bounds = array<i64: 64, 1>}, {pipeline_mode = #tpu.pipeline_mode<synchronous>, transform_indices = @transform_3, window_bounds = array<i64: 2, 64>}, {pipeline_mode = #tpu.pipeline_mode<synchronous>, transform_indices = @transform_4, window_bounds = array<i64: 2, 1>}, {transform_indices = @transform_5, window_bounds = array<i64: 2, 128>}]} {
    %c0 = arith.constant 0 : index
    %c0_0 = arith.constant 0 : index
    %0 = vector.load %arg2[%c0, %c0_0] : memref<64x32xbf16, #tpu.memory_space<vmem>>, vector<64x32xbf16>
    %c0_1 = arith.constant 0 : index
    %c0_2 = arith.constant 0 : index
    %1 = vector.load %arg1[%c0_1, %c0_2] : memref<128x32xbf16, #tpu.memory_space<vmem>>, vector<128x32xbf16>
    %cst = arith.constant dense<0.000000e+00> : vector<64x128xf32>
    %2 = tpu.matmul %0, %1, %cst {dimension_numbers = #tpu.dot_dimension_numbers<[1], [1], [0], [0], [0, 0, 1, 0], [], []>} : vector<64x32xbf16>, vector<128x32xbf16>, vector<64x128xf32> -> vector<64x128xf32>
    %c0_3 = arith.constant 0 : index
    %c0_4 = arith.constant 0 : index
    %3 = vector.load %arg3[%c0_3, %c0_4] : memref<64x1xf32, #tpu.memory_space<vmem>>, vector<64x1xf32>
    %4 = vector.broadcast %3 : vector<64x1xf32> to vector<64x128xf32>
    %5 = arith.addf %2, %4 : vector<64x128xf32>
    %cst_5 = arith.constant 0.000000e+00 : f32
    %6 = vector.broadcast %cst_5 : f32 to vector<64x128xf32>
    %7 = arith.maximumf %5, %6 : vector<64x128xf32>
    %c0_6 = arith.constant 0 : index
    %c0_7 = arith.constant 0 : index
    %8 = vector.load %arg4[%c0_6, %c0_7] : memref<2x64xf32, #tpu.memory_space<vmem>>, vector<2x64xf32>
    %cst_8 = arith.constant dense<0.000000e+00> : vector<2x128xf32>
    %9 = tpu.matmul %8, %7, %cst_8 {dimension_numbers = #tpu.dot_dimension_numbers<[1], [0], [0], [1], [0, 0, 1, 1], [], []>} : vector<2x64xf32>, vector<64x128xf32>, vector<2x128xf32> -> vector<2x128xf32>
    %c0_9 = arith.constant 0 : index
    %c0_10 = arith.constant 0 : index
    %10 = vector.load %arg5[%c0_9, %c0_10] : memref<2x1xf32, #tpu.memory_space<vmem>>, vector<2x1xf32>
    %11 = vector.broadcast %10 : vector<2x1xf32> to vector<2x128xf32>
    %12 = arith.addf %9, %11 : vector<2x128xf32>
    %c0_11 = arith.constant 0 : index
    %c0_12 = arith.constant 0 : index
    %13 = vector.load %arg6[%c0_11, %c0_12] : memref<2x128xf32, #tpu.memory_space<vmem>>, vector<2x128xf32>
    tpu.vector_store %arg6[%c0_11, %c0_12], %12 {strides = array<i32>} : memref<2x128xf32, #tpu.memory_space<vmem>>, vector<2x128xf32>,
    return
  }
  func.func @transform_0(%arg0: i32) -> (i32, i32) {
    %c0_i32 = arith.constant 0 : i32
    %c0_i32_0 = arith.constant 0 : i32
    return %arg0, %c0_i32 : i32, i32
  }
  func.func @transform_1(%arg0: i32) -> (i32, i32) {
    %c0_i32 = arith.constant 0 : i32
    %c0_i32_0 = arith.constant 0 : i32
    %c0_i32_1 = arith.constant 0 : i32
    return %c0_i32, %c0_i32_0 : i32, i32
  }
  func.func @transform_2(%arg0: i32) -> (i32, i32) {
    %c0_i32 = arith.constant 0 : i32
    %c0_i32_0 = arith.constant 0 : i32
    %c0_i32_1 = arith.constant 0 : i32
    return %c0_i32, %c0_i32_0 : i32, i32
  }
  func.func @transform_3(%arg0: i32) -> (i32, i32) {
    %c0_i32 = arith.constant 0 : i32
    %c0_i32_0 = arith.constant 0 : i32
    %c0_i32_1 = arith.constant 0 : i32
    return %c0_i32, %c0_i32_0 : i32, i32
  }
  func.func @transform_4(%arg0: i32) -> (i32, i32) {
    %c0_i32 = arith.constant 0 : i32
    %c0_i32_0 = arith.constant 0 : i32
    %c0_i32_1 = arith.constant 0 : i32
    return %c0_i32, %c0_i32_0 : i32, i32
  }
  func.func @transform_5(%arg0: i32) -> (i32, i32) {
    %c0_i32 = arith.constant 0 : i32
    %c0_i32_0 = arith.constant 0 : i32
    return %c0_i32, %arg0 : i32, i32
  }
}

</mosaic_0001>

<bundles_post_ra>
// kernel: tpu_custom_call.1
= control target key start
LH: loop header
LB: loop body
LE: loop exit
PB: predicated region body
PF: predicated region fallthrough
CT: control target
= control target key end

     0   :  { %10 = vsyncpa [#allocation3], 0  ;;  %s1059_s0 = inlined_call_operand.vmem [shape: bf16[200,32], index: 0, kind: input, shape index: {}]   ;;  %s1060_s1 = inlined_call_operand.vmem [shape: bf16[64,32], index: 1, kind: input, shape index: {}]   ;;  %s1061_s2 = inlined_call_operand.vmem [shape: f32[64,1], index: 2, kind: input, shape index: {}]   ;;  %s1062_s3 = inlined_call_operand.vmem [shape: f32[2,64], index: 3, kind: input, shape index: {}]   ;;  %s1063_s4 = inlined_call_operand.vmem [shape: f32[2,1], index: 4, kind: input, shape index: {}]   ;;  %s1064_s5 = inlined_call_operand.hbm [shape: f32[2,200], index: 5, kind: output, shape index: {}]  }
   0x1   :  { %12 = vsyncpa [#allocation3 + $0x1], 0  ;;  %s895_s18 = smov 0   ;;  %s897_s19 = smov 0  }
   0x2   :  { %s899_s20 = smov 0   ;;  %s901_s21 = smov 0  }
   0x3 LB: > { %s916_s22 = sadd.s32 4294967295, %s859_s21   ;;  %s643_s23 = sadd.s32 4294967294, %s859_s21   ;;  %s859_s21 = sphi %s901_s21, %s1070_s21   ;;  %s855_s20 = sphi %s899_s20, %s1069_s20   ;;  %s851_s19 = sphi %s897_s19, %s1068_s19   ;;  %s847_s18 = sphi %s895_s18, %s1067_s18  }
   0x4   : > { %s920_s24 = sadd.s32 1, %s859_s21   ;;  %s135_s25 = sadd.s32 1, %s855_s20 }
   0x5   : > { %s132_s26 = ssub.s32 %s859_s21, %s920_s24  ;;  %p145_p0 = scmp.ne.s32.totalorder %s855_s20, %s851_s19 }
   0x6   : > { %p133_p1 = scmp.eq.s32.totalorder %s132_s26, 0  ;;  %p146_p2 = scmp.eq.s32.totalorder %s916_s22, 1 }
   0x7   : > { %p151_p3 = scmp.ne.s32.totalorder %s851_s19, %s847_s18  ;;  %p152_p4 = scmp.eq.s32.totalorder %s643_s23, 1 }
   0x8   : > { %s931_s27 = scalar_select %p133_p1, %s855_s20, %s135_s25  }
   0x9   : > { %p933_p5 = por %p146_p2, %p145_p0  ;;  %p937_p6 = por %p152_p4, %p151_p3 }
   0xa   : > { %p646_p7 = scmp.ge.s32.totalorder %s859_s21, 1  ;;  %p199_p8 = scmp.lt.s32.totalorder %s859_s21, 3 }
   0xc   : > { %p200_p9 = pnand %p646_p7, %p199_p8 }
   0xd   : > { %s648_s30 = sshll.u32 (!%p200_p9), %s916_s22, 4  ;;  %s228_s6 = sand.u32 (!%p200_p9), 1, %s851_s19  }
   0xe   : > { %203 = sbr.rel (%p200_p9) target bundleno = 519 (0x207), region = 40  ;;  %p236_p10 = scmp.lt.s32.totalorder (!%p200_p9), %s648_s30, 24 }
   0xf   : > { %s647_s7 = sshll.u32 (!%p200_p9), %s228_s6, 1  ;;  %s668_s8 = sshll.u32 (!%p200_p9), %s916_s22, 5 }
  0x10   : > { %s230_s9 = scalar_lea.vmem (!%p200_p9), [#allocation2], %s647_s7  ;;  %s1024_s13 = scalar_lea.hbm (!%p200_p9), %s1064_s5, %s668_s8 }
  0x11   : > { %s584_s10 = sshll.u32 (!%p200_p9), %s230_s9, 4  ;;  %s571_s14 = scalar_lea.sflag (!%p200_p9), [#allocation3], %s228_s6  ;;  %s585_s10 = int_to_ptr.vmem [resolvable:$true] %s584_s10 }
  0x12   : > { %s799_s16 = scalar_lea.vmem (!%p200_p9), %s585_s10, 32  ;;  %s864_s22 = smov (!%p200_p9), [#allocation2]  }
  0x13   : > { %v795_v0 = vld [vmem:[%s1060_s1] sm:$0xff]   ;;  %vm378_vm0 = vcmask 261120   ;;  %s1072_s30 = smov (!%p236_p10, %s648_s30), 24  ;;  %v861_v1 = vmov 0   ;;  %v275_v2 = vld [vmem:[%s1061_s2 + $0x28] sm:$0xff]  ;;  %v277_v3 = vld [vmem:[%s1061_s2 + $0x38] sm:$0xff]  ;;  %p800_p11 = scmp.ne.s32.totalorder %s585_s10, %s799_s16 }
  0x14   : > { %708 = vmatprep.mubr.msk.bf16.mxu0 %vm378_vm0, %v795_v0  ;;  %786 = vset.pattern.permute.xlu1 %v861_v1  ;;  %s649_s12 = sshll.u32 %s1072_s30, 2  ;;  %v274_v4 = vld [vmem:[%s1061_s2 + $0x20] sm:$0xff]  ;;  %v276_v5 = vld [vmem:[%s1061_s2 + $0x30] sm:$0xff]  ;;  %v273_v10 = vld [vmem:[%s1061_s2 + $0x18] sm:$0xff]  ;;  %v862_v30 = vmov 0.0   ;;  %vm863_vm1 = vmmov 0  }
  0x15   : > { %785 = vset.pattern.permute.xlu0 %v861_v1  ;;  %305 = vperm.xlu1 %786, %v275_v2   ;;  %s957_s15 = scalar_lea.vmem %s1059_s0, %s649_s12  ;;  %v272_v9 = vld [vmem:[%s1061_s2 + $0x10] sm:$0xff]  ;;  %v270_v11 = vld [vmem:[%s1061_s2] sm:$0xff]  ;;  %v271_v14 = vld [vmem:[%s1061_s2 + $0x8] sm:$0xff]  ;;  %vm495_vm2 = vcmask 523264   ;;  %p801_p12 = pnand %p800_p11, %p933_p5 }
  0x16   : > { %315 = vperm.xlu0 %785, %v277_v3   ;;  %v787_v6 = vld [vmem:[%s957_s15 + $0x38] sm:$0xff]   ;;  %v788_v7 = vld [vmem:[%s957_s15 + $0x30] sm:$0xff]   ;;  %v789_v13 = vld [vmem:[%s957_s15 + $0x28] sm:$0xff]   ;;  %716 = vmatprep.subr.mxu1 %v862_v30  ;;  %s803_s17 = sshll.u32 %s864_s22, 4  ;;  %s804_s17 = int_to_ptr.vmem [resolvable:$false] %s803_s17 }
  0x17   : > { %735 = vmatprep.subr.msk.bf16.mxu0 %vm378_vm0, %v787_v6  ;;  %v413_v8 = vsel %vm378_vm0, %v787_v6, 0  ;;  %v410_v12 = vsel %vm378_vm0, %v788_v7, 0  ;;  %v489_v15 = vld [vmem:[%s1063_s4] sm:$0x3]  ;;  %v407_v16 = vsel %vm378_vm0, %v789_v13, 0  ;;  %v791_v19 = vld [vmem:[%s957_s15 + $0x18] sm:$0xff]   ;;  %732 = vmatprep.mubr.msk.f32.mxu1 %vm863_vm1, %v862_v30  ;;  %p802_p13 = pneg %p801_p12  ;;  %p806_p0 = scmp.lt.s32.totalorder %s585_s10, %s804_s17 }
  0x18   : > { %693 = vmatpush3.bf16.xpose.msra.mxu0 %v413_v8  ;;  %v790_v17 = vld [vmem:[%s957_s15 + $0x20] sm:$0xff]   ;;  %v401_v20 = vsel %vm378_vm0, %v791_v19, 0  ;;  %v792_v21 = vld [vmem:[%s957_s15 + $0x10] sm:$0xff]   ;;  %v793_v23 = vld [vmem:[%s957_s15 + $0x8] sm:$0xff]   ;;  %s805_s23 = scalar_lea.vmem %s804_s17, 64 }
  0x19   : > { %300 = vperm.xlu1 %786, %v274_v4   ;;  %736 = vmatprep.subr.msk.bf16.mxu0 %vm378_vm0, %v788_v7  ;;  %v404_v18 = vsel %vm378_vm0, %v790_v17, 0  ;;  %v398_v22 = vsel %vm378_vm0, %v792_v21, 0  ;;  %v395_v24 = vsel %vm378_vm0, %v793_v23, 0  ;;  %v794_v25 = vld [vmem:[%s957_s15] sm:$0xff]   ;;  %v796_v27 = vld [vmem:[%s1060_s1 + $0x8] sm:$0xff]   ;;  %v797_v28 = vld [vmem:[%s1060_s1 + $0x10] sm:$0xff]   ;;  %p807_p1 = scmp.lt.s32.totalorder %s805_s23, %s799_s16 }
  0x1a   : > { %310 = vperm.xlu0 %785, %v276_v5   ;;  %v392_v26 = vsel %vm378_vm0, %v794_v25, 0  ;;  %v798_v29 = vld [vmem:[%s1060_s1 + $0x18] sm:$0xff]   ;;  %v488_v63 = vld [vmem:[%s1062_s3] sm:$0x3] }
  0x1b   : > { %p808_p2 = por %p807_p1, %p806_p0 }
  0x1d   : > { %290 = vperm.xlu1 %786, %v272_v9   ;;  %p809_p3 = pnand %p808_p2, %p802_p13 }
  0x1e   : > { %295 = vperm.xlu0 %785, %v273_v10  }
  0x20   : > { %695 = vmatpush3.bf16.xpose.msra.mxu0 %v410_v12 }
  0x21   : > { %280 = vperm.xlu1 %786, %v270_v11   ;;  %737 = vmatprep.subr.msk.bf16.mxu0 %vm378_vm0, %v789_v13 }
  0x22   : > { %285 = vperm.xlu0 %785, %v271_v14  }
  0x26   : > { %492 = vperm.xlu0 %785, %v489_v15  }
  0x28   : > { %697 = vmatpush3.bf16.xpose.msra.mxu0 %v407_v16 }
  0x29   : > { %738 = vmatprep.subr.msk.bf16.mxu0 %vm378_vm0, %v790_v17 }
  0x30   : > { %699 = vmatpush3.bf16.xpose.msra.mxu0 %v404_v18 }
  0x31   : > { %739 = vmatprep.subr.msk.bf16.mxu0 %vm378_vm0, %v791_v19 }
  0x38   : > { %701 = vmatpush3.bf16.xpose.msra.mxu0 %v401_v20 }
  0x39   : > { %740 = vmatprep.subr.msk.bf16.mxu0 %vm378_vm0, %v792_v21 }
  0x40   : > { %703 = vmatpush3.bf16.xpose.msra.mxu0 %v398_v22 }
  0x41   : > { %741 = vmatprep.subr.msk.bf16.mxu0 %vm378_vm0, %v793_v23 }
  0x48   : > { %705 = vmatpush3.bf16.xpose.msra.mxu0 %v395_v24 }
  0x49   : > { %742 = vmatprep.subr.msk.bf16.mxu0 %vm378_vm0, %v794_v25 }
  0x50   : > { %707 = vmatpush3.bf16.xpose.msra.mxu0 %v392_v26 }
  0x57   : > { %709 = vmatmul.mubr.msk.bf16.vlgmr.msra.gmra.mxu0 %vm378_vm0, %v796_v27 }
  0x58   : > { %712 = vmatprep.mubr.msk.bf16.mxu0 %vm378_vm0, %v797_v28 }
  0x5f   : > { %713 = vmatmul.mubr.msk.bf16.gmra.mxu0 %vm378_vm0, %v798_v29 }
  0x90   : > { %v306_v34 = vpop.permute.xlu1 %305 }
  0x91   : > { %v316_v32 = vpop.permute.xlu0 %315 }
  0x94   : > { %v301_v39 = vpop.permute.xlu1 %300 }
  0x95   : > { %v311_v37 = vpop.permute.xlu0 %310 }
  0x98   : > { %v291_v48 = vpop.permute.xlu1 %290 }
  0x99   : > { %v296_v44 = vpop.permute.xlu0 %295 }
  0x9c   : > { %v281_v56 = vpop.permute.xlu1 %280 }
  0x9d   : > { %v286_v53 = vpop.permute.xlu0 %285 }
  0xa1   : > { %v493_v0 = vpop.permute.xlu0 %492 }
 0x117   : > { %v710_v31 = vpop.f32.mrf.mxu0 }
 0x118   : > { %v458_v54 = vadd.f32 %v710_v31, %v291_v48 }
 0x119   : > { %v449_v33 = vpop.f32.mrf.mxu0 }
 0x11a   : > { %v482_v59 = vmax.f32 %v458_v54, 0.0  ;;  %v450_v60 = vadd.f32 %v449_v33, %v281_v56 }
 0x11b   : > { %v711_v35 = vpop.f32.mrf.mxu0 }
 0x11c   : > { %v461_v51 = vadd.f32 %v711_v35, %v296_v44  ;;  %v480_v62 = vmax.f32 %v450_v60, 0.0 }
 0x11d   : > { %v452_v36 = vpop.f32.mrf.mxu0 }
 0x11e   : > { %v483_v57 = vmax.f32 %v461_v51, 0.0  ;;  %v453_v58 = vadd.f32 %v452_v36, %v286_v53 }
 0x11f   : > { %v714_v38 = vpop.f32.mrf.mxu0 }
 0x120   : > { %v474_v42 = vadd.f32 %v714_v38, %v311_v37  ;;  %v481_v61 = vmax.f32 %v453_v58, 0.0 }
 0x121   : > { %v465_v40 = vpop.f32.mrf.mxu0 }
 0x122   : > { %v486_v49 = vmax.f32 %v474_v42, 0.0  ;;  %v466_v50 = vadd.f32 %v465_v40, %v301_v39 }
 0x123   : > { %v715_v41 = vpop.f32.mrf.mxu0 }
 0x124   : > { %v477_v43 = vadd.f32 %v715_v41, %v316_v32  ;;  %v484_v55 = vmax.f32 %v466_v50, 0.0 }
 0x125   : > { %v468_v45 = vpop.f32.mrf.mxu0 }
 0x126   : > { %v487_v46 = vmax.f32 %v477_v43, 0.0  ;;  %v469_v47 = vadd.f32 %v468_v45, %v306_v34 }
 0x128   : > { %717 = vmatpush3.msra.mxu1 %v487_v46  ;;  %v485_v52 = vmax.f32 %v469_v47, 0.0 }
 0x129   : > { %718 = vmatprep.subr.mxu1 %v862_v30 }
 0x12a   : > { %719 = vmatpush3.msra.mxu1 %v486_v49 }
 0x12b   : > { %720 = vmatprep.subr.mxu1 %v862_v30 }
 0x12c   : > { %721 = vmatpush3.msra.mxu1 %v485_v52 }
 0x12d   : > { %722 = vmatprep.subr.mxu1 %v862_v30 }
 0x12e   : > { %723 = vmatpush3.msra.mxu1 %v484_v55 }
 0x12f   : > { %724 = vmatprep.subr.mxu1 %v862_v30 }
 0x130   : > { %725 = vmatpush3.msra.mxu1 %v483_v57 }
 0x131   : > { %726 = vmatprep.subr.mxu1 %v862_v30 }
 0x132   : > { %727 = vmatpush3.msra.mxu1 %v482_v59 }
 0x133   : > { %728 = vmatprep.subr.mxu1 %v862_v30 }
 0x134   : > { %729 = vmatpush3.msra.mxu1 %v481_v61 }
 0x135   : > { %730 = vmatprep.subr.mxu1 %v862_v30 }
 0x136   : > { %731 = vmatpush3.msra.mxu1 %v480_v62 }
 0x137   : > { %733 = vmatmul.mubr.msk.f32.vlgmr.msra.gmra.mxu1 %vm495_vm2, %v488_v63 }
 0x1f7   : > { %v565_v1 = vpop.f32.mrf.mxu1 }
 0x1f8   : > { %v566_v2 = vadd.f32 %v565_v1, %v493_v0 }
 0x1f9   : > { %v734_v3 = vpop.f32.mrf.mxu1 }
 0x1fa   : > { %569 = vst [vmem:[%s230_s9] sm:$0x3] %v566_v2 }
 0x1fb   : > { %812 = shalt.err (!%p809_p3)
}
 0x1fc   : > { %s813_s25 = scalar_lea.hbm %s1024_s13, 32  ;;  %s817_s30 = scalar_lea.hbm %s1064_s5, 64 }
 0x1fd   : > { %p814_p4 = scmp.ne.s32.totalorder %s1024_s13, %s813_s25  ;;  %p818_p9 = scmp.lt.s32.totalorder %s1024_s13, %s1064_s5 }
 0x1fe   : > { %p819_p10 = scmp.lt.s32.totalorder %s817_s30, %s813_s25 }
 0x1ff   : > { %p815_p7 = pnand %p814_p4, %p933_p5 }
 0x200   : > { %p820_p11 = por %p819_p10, %p818_p9 }
 0x201   : > { %p816_p8 = pneg %p815_p7 }
 0x203   : > { %p821_p12 = pnand %p820_p11, %p816_p8 }
 0x205   : > { %824 = shalt.err (!%p821_p12)
}
 0x206   : > { %743 = dma.vmem_to_hbm [thread:$0]  (%p933_p5), %s585_s10, 32, %s1024_s13, %s571_s14  }
 0x207 PF: > { %p749_p13 = scmp.ge.s32.totalorder %s859_s21, 2  ;;  %s596_s8 = sand.u32 1, %s847_s18  }
 0x208   : > { %s597_s9 = scalar_lea.sflag [#allocation3], %s596_s8 }
 0x209   : > { %p746_p0 = pnand %p749_p13, %p937_p6 }
 0x20b   : > { %p747_p1 = pneg %p746_p0 }
 0x20d   : > { %842 = dma.done.wait (%p747_p1), %s597_s9, 32  }
 0x20e   : > { %844 = vsyncadd (%p747_p1), %s597_s9, 4294967264  ;;  %p15_p2 = scmp.ge.s32.totalorder %s920_s24, 4   ;;  %s1067_s18 = smov %s851_s19 }
 0x20f   : > { %s1068_s19 = smov %s855_s20  ;;  %s1069_s20 = smov %s931_s27 }
 0x210   : > { %s1070_s21 = smov %s920_s24  ;;  %17 = sbr.rel (!%p15_p2) target bundleno = 3 (0x3), region = 75 }
 0x215   :  { %602 = vsyncpa [#allocation3], 1 }
 0x216   :  { %604 = vsyncpa [#allocation3 + $0x1], 1 }

</bundles_post_ra>
